<compile_context>
chip_gen: v7x
topology: tpu7x:2x2x1
jax: 0.10.0
libtpu: 0.0.40
codegen_flags: <defaults>
</compile_context>

<pallas_src>
import math

import jax
import jax.numpy as jnp
from jax import lax
from jax.experimental import pallas as pl
from jax.experimental.pallas import tpu as pltpu


# ----------------------------------------------------------------------------
# Fused ResidualBlock kernel (lane-dense (C, H*W) tiles, bf16 MXU operands)
# ----------------------------------------------------------------------------
def resblock_kernel(x_ref, w1_ref, b1_ref, w2_ref, b2_ref, mp_ref, mn_ref,
                    o_ref):
    mp = mp_ref[...]                                   # (1, tm) f32: w > 0
    mn = mn_ref[...]                                   # (1, tm) f32: w < W-1
    x = x_ref[...].astype(jnp.float32)                 # (C, tm)
    tm = x.shape[1]

    # conv1 +-1 W-neighbours via XLU lane rolls.  tm is a multiple of W, so the
    # wrap-around lanes land exactly on the masked w==0 / w==W-1 positions.
    x_prev = pltpu.roll(x, shift=1, axis=1) * mp
    x_next = pltpu.roll(x, shift=tm - 1, axis=1) * mn
    x_taps = jnp.concatenate([x_prev, x, x_next], axis=0).astype(jnp.bfloat16)

    # conv1 (BN1 scale folded into weights) as one MXU matmul, f32 accumulate
    a = jnp.dot(w1_ref[...], x_taps, preferred_element_type=jnp.float32)
    a = jnp.maximum(a + b1_ref[...], 0.0)              # BN1 shift + ReLU

    # conv2 taps and single MXU matmul
    a_prev = pltpu.roll(a, shift=1, axis=1) * mp
    a_next = pltpu.roll(a, shift=tm - 1, axis=1) * mn
    a_taps = jnp.concatenate([a_prev, a, a_next], axis=0).astype(jnp.bfloat16)

    out = jnp.dot(w2_ref[...], a_taps, preferred_element_type=jnp.float32)
    out = out + b2_ref[...]                            # BN2 shift
    o_ref[...] = jnp.maximum(out + x, 0.0)             # + residual, ReLU


def _tile_m(M, W, cap=8192):
    """Tile size along the per-image flattened H*W lane axis.

    Must divide M and be a multiple of W (rolls only wrap at masked boundary
    lanes) and ideally of 128 (unmasked lane-dense stores).  Large tiles
    amortize per-grid-step overhead; capped so the double-buffered working set
    stays a few MiB (fits v7x's smaller VMEM and v5e's 16 MiB scoped default).
    """
    base = (W * 128) // math.gcd(W, 128)
    if M % base != 0:
        # TODO(synk): pad M to a multiple of 128 instead of one full-array tile
        # (a very large, oddly-shaped M could exceed the scoped-VMEM default).
        return M
    best = base
    mult = M // base
    for d in range(1, mult + 1):
        if mult % d == 0 and base * d <= cap:
            best = base * d
    return best


# ----------------------------------------------------------------------------
# Forward wrapper: weight folding + one pallas_call (no extra HBM passes)
# ----------------------------------------------------------------------------
@jax.jit
def residual_block_forward(x, params):
    eps = 1e-5
    B, C, H, W = x.shape
    conv1_w = params['conv1_w']                        # (NF, C, 1, KW)
    conv2_w = params['conv2_w']                        # (NF, NF, 1, KW)
    NF, _, _, KW = conv1_w.shape
    assert KW == 3 and conv2_w.shape == (NF, NF, 1, KW)
    assert C == NF, "downsample=None requires in_channel == nb_filter"
    M = H * W

    tm = _tile_m(M, W)
    grid = (B, M // tm)

    # fold BatchNorm (eval mode, conv bias=False) into weights / shifts
    s1 = params['bn1_gamma'] / jnp.sqrt(params['bn1_var'] + eps)
    b1 = (params['bn1_beta'] - s1 * params['bn1_mean']).reshape(NF, 1)
    s2 = params['bn2_gamma'] / jnp.sqrt(params['bn2_var'] + eps)
    b2 = (params['bn2_beta'] - s2 * params['bn2_mean']).reshape(NF, 1)

    # (NF, C, 1, KW) -> (NF, KW*C); column blocks ordered [tap0 | tap1 | tap2]
    # (prev / mid / next neighbour), channel-major inside each block — matches
    # the in-kernel jnp.concatenate([x_prev, x, x_next]).
    w1 = (conv1_w[:, :, 0, :] * s1[:, None, None]).transpose(0, 2, 1)
    w1 = w1.reshape(NF, KW * C).astype(jnp.bfloat16)
    w2 = (conv2_w[:, :, 0, :] * s2[:, None, None]).transpose(0, 2, 1)
    w2 = w2.reshape(NF, KW * NF).astype(jnp.bfloat16)
    b1 = b1.astype(jnp.float32)
    b2 = b2.astype(jnp.float32)

    # boundary masks (identical for every tile since tm % W == 0)
    w_pos = jnp.arange(tm, dtype=jnp.int32) % W
    mask_prev = (w_pos > 0).astype(jnp.float32).reshape(1, tm)
    mask_next = (w_pos < W - 1).astype(jnp.float32).reshape(1, tm)

    # lane-dense bf16 activation slab: NCHW -> (B, C, H*W) is a free reshape
    x_flat = x.reshape(B, C, M).astype(jnp.bfloat16)

    out = pl.pallas_call(
        resblock_kernel,
        grid=grid,
        in_specs=[
            pl.BlockSpec((None, C, tm), lambda b, i: (b, 0, i)),   # x tile
            pl.BlockSpec((NF, KW * C), lambda b, i: (0, 0)),       # conv1 w
            pl.BlockSpec((NF, 1), lambda b, i: (0, 0)),            # bn1 shift
            pl.BlockSpec((NF, KW * NF), lambda b, i: (0, 0)),      # conv2 w
            pl.BlockSpec((NF, 1), lambda b, i: (0, 0)),            # bn2 shift
            pl.BlockSpec((1, tm), lambda b, i: (0, 0)),            # prev mask
            pl.BlockSpec((1, tm), lambda b, i: (0, 0)),            # next mask
        ],
        out_specs=pl.BlockSpec((None, NF, tm), lambda b, i: (b, 0, i)),
        out_shape=jax.ShapeDtypeStruct((B, NF, M), jnp.float32),
        compiler_params=pltpu.CompilerParams(
            dimension_semantics=("parallel", "parallel")),
    )(x_flat, w1, b1, w2, b2, mask_prev, mask_next)

    return out.reshape(B, NF, H, W)                    # free reshape to NCHW


# ----------------------------------------------------------------------------
# Pure-JAX reference (f32, HIGHEST precision) and parameter init
# ----------------------------------------------------------------------------
def resblock_reference(x, p, eps=1e-5):
    dn = ('NCHW', 'OIHW', 'NCHW')
    out = lax.conv_general_dilated(x, p['conv1_w'], window_strides=(1, 1),
                                   padding=((0, 0), (1, 1)), dimension_numbers=dn,
                                   precision=lax.Precision.HIGHEST)
    s1 = p['bn1_gamma'] / jnp.sqrt(p['bn1_var'] + eps)
    out = out * s1[None, :, None, None] + (p['bn1_beta'] - s1 * p['bn1_mean'])[None, :, None, None]
    out = jnp.maximum(out, 0.0)
    out = lax.conv_general_dilated(out, p['conv2_w'], window_strides=(1, 1),
                                   padding=((0, 0), (1, 1)), dimension_numbers=dn,
                                   precision=lax.Precision.HIGHEST)
    s2 = p['bn2_gamma'] / jnp.sqrt(p['bn2_var'] + eps)
    out = out * s2[None, :, None, None] + (p['bn2_beta'] - s2 * p['bn2_mean'])[None, :, None, None]
    return jnp.maximum(out + x, 0.0)


def init_params(key, *, in_channel, nb_filter, kw=3):
    keys = iter(jax.random.split(key, 16))

    def rnd(shape, scale=0.1):
        return scale * jax.random.normal(next(keys), shape, dtype=jnp.float32)

    p = {}
    p['conv1_w'] = rnd((nb_filter, in_channel, 1, kw))
    p['bn1_gamma'] = 1.0 + rnd((nb_filter,))
    p['bn1_beta'] = rnd((nb_filter,))
    p['bn1_mean'] = rnd((nb_filter,))
    p['bn1_var'] = 1.0 + jnp.abs(rnd((nb_filter,)))
    p['conv2_w'] = rnd((nb_filter, nb_filter, 1, kw))
    p['bn2_gamma'] = 1.0 + rnd((nb_filter,))
    p['bn2_beta'] = rnd((nb_filter,))
    p['bn2_mean'] = rnd((nb_filter,))
    p['bn2_var'] = 1.0 + jnp.abs(rnd((nb_filter,)))
    return p


if __name__ == "__main__":
    # in_channel == nb_filter == 16 (default downsample=None requires this)
    B, C, H, W = 2, 16, 8, 16
    NB_FILTER = 16

    key = jax.random.PRNGKey(0)
    kx, kp = jax.random.split(key)
    x = jax.random.normal(kx, (B, C, H, W), dtype=jnp.float32)
    params = init_params(kp, in_channel=C, nb_filter=NB_FILTER, kw=3)

    out = residual_block_forward(x, params)
    out = jax.block_until_ready(out)

    assert out.shape == (B, NB_FILTER, H, W), out.shape
    assert bool(jnp.all(jnp.isfinite(out)))

    ref = resblock_reference(x, params)
    max_err = float(jnp.max(jnp.abs(out - ref)))
    # bf16 activation/weight streams (f32 accumulation) => bf16-class tolerance
    assert max_err < 3e-2, f"max abs error vs reference: {max_err}"

    print("KERNEL_OK")
</pallas_src>

<mosaic_0001>
module attributes {stable_mosaic.version = 11 : i64} {
  func.func @resblock_kernel(%arg0: i32, %arg1: i32, %arg2: memref<1x16x128xbf16, #tpu.memory_space<vmem>>, %arg3: memref<16x48xbf16, #tpu.memory_space<vmem>>, %arg4: memref<16x1xf32, #tpu.memory_space<vmem>>, %arg5: memref<16x48xbf16, #tpu.memory_space<vmem>>, %arg6: memref<16x1xf32, #tpu.memory_space<vmem>>, %arg7: memref<1x128xf32, #tpu.memory_space<vmem>>, %arg8: memref<1x128xf32, #tpu.memory_space<vmem>>, %arg9: memref<1x16x128xf32, #tpu.memory_space<vmem>>) attributes {dimension_semantics = [#tpu.dimension_semantics<parallel>, #tpu.dimension_semantics<parallel>], iteration_bounds = array<i64: 2, 1>, scalar_prefetch = 0 : i64, scratch_operands = 0 : i64, tpu.core_type = #tpu.core_type<tc>, window_params = [{transform_indices = @transform_0, window_bounds = array<i64: 1, 16, 128>}, {pipeline_mode = #tpu.pipeline_mode<synchronous>, transform_indices = @transform_1, window_bounds = array<i64: 16, 48>}, {pipeline_mode = #tpu.pipeline_mode<synchronous>, transform_indices = @transform_2, window_bounds = array<i64: 16, 1>}, {pipeline_mode = #tpu.pipeline_mode<synchronous>, transform_indices = @transform_3, window_bounds = array<i64: 16, 48>}, {pipeline_mode = #tpu.pipeline_mode<synchronous>, transform_indices = @transform_4, window_bounds = array<i64: 16, 1>}, {pipeline_mode = #tpu.pipeline_mode<synchronous>, transform_indices = @transform_5, window_bounds = array<i64: 1, 128>}, {pipeline_mode = #tpu.pipeline_mode<synchronous>, transform_indices = @transform_6, window_bounds = array<i64: 1, 128>}, {transform_indices = @transform_7, window_bounds = array<i64: 1, 16, 128>}]} {
    %c0 = arith.constant 0 : index
    %c0_0 = arith.constant 0 : index
    %0 = vector.load %arg7[%c0, %c0_0] : memref<1x128xf32, #tpu.memory_space<vmem>>, vector<1x128xf32>
    %c0_1 = arith.constant 0 : index
    %c0_2 = arith.constant 0 : index
    %1 = vector.load %arg8[%c0_1, %c0_2] : memref<1x128xf32, #tpu.memory_space<vmem>>, vector<1x128xf32>
    %c0_3 = arith.constant 0 : index
    %c0_4 = arith.constant 0 : index
    %c0_5 = arith.constant 0 : index
    %2 = vector.load %arg2[%c0_3, %c0_4, %c0_5] : memref<1x16x128xbf16, #tpu.memory_space<vmem>>, vector<1x16x128xbf16>
    %3 = vector.shape_cast %2 : vector<1x16x128xbf16> to vector<16x128xbf16>
    %4 = arith.extf %3 : vector<16x128xbf16> to vector<16x128xf32>
    %c1_i32 = arith.constant 1 : i32
    %5 = tpu.dynamic_rotate %4 by %c1_i32 dim 1 : vector<16x128xf32>, i32 -> vector<16x128xf32>
    %6 = vector.broadcast %0 : vector<1x128xf32> to vector<16x128xf32>
    %7 = arith.mulf %5, %6 : vector<16x128xf32>
    %c127_i32 = arith.constant 127 : i32
    %8 = tpu.dynamic_rotate %4 by %c127_i32 dim 1 : vector<16x128xf32>, i32 -> vector<16x128xf32>
    %9 = vector.broadcast %1 : vector<1x128xf32> to vector<16x128xf32>
    %10 = arith.mulf %8, %9 : vector<16x128xf32>
    %11 = tpu.concatenate %7, %4, %10 in 0 : vector<16x128xf32>, vector<16x128xf32>, vector<16x128xf32> -> vector<48x128xf32>
    %12 = arith.truncf %11 : vector<48x128xf32> to vector<48x128xbf16>
    %c0_6 = arith.constant 0 : index
    %c0_7 = arith.constant 0 : index
    %13 = vector.load %arg3[%c0_6, %c0_7] : memref<16x48xbf16, #tpu.memory_space<vmem>>, vector<16x48xbf16>
    %cst = arith.constant dense<0.000000e+00> : vector<16x128xf32>
    %14 = tpu.matmul %13, %12, %cst {dimension_numbers = #tpu.dot_dimension_numbers<[1], [0], [0], [1], [0, 0, 1, 1], [], []>} : vector<16x48xbf16>, vector<48x128xbf16>, vector<16x128xf32> -> vector<16x128xf32>
    %c0_8 = arith.constant 0 : index
    %c0_9 = arith.constant 0 : index
    %15 = vector.load %arg4[%c0_8, %c0_9] : memref<16x1xf32, #tpu.memory_space<vmem>>, vector<16x1xf32>
    %16 = vector.broadcast %15 : vector<16x1xf32> to vector<16x128xf32>
    %17 = arith.addf %14, %16 : vector<16x128xf32>
    %cst_10 = arith.constant 0.000000e+00 : f32
    %18 = vector.broadcast %cst_10 : f32 to vector<16x128xf32>
    %19 = arith.maximumf %17, %18 : vector<16x128xf32>
    %c1_i32_11 = arith.constant 1 : i32
    %20 = tpu.dynamic_rotate %19 by %c1_i32_11 dim 1 : vector<16x128xf32>, i32 -> vector<16x128xf32>
    %21 = vector.broadcast %0 : vector<1x128xf32> to vector<16x128xf32>
    %22 = arith.mulf %20, %21 : vector<16x128xf32>
    %c127_i32_12 = arith.constant 127 : i32
    %23 = tpu.dynamic_rotate %19 by %c127_i32_12 dim 1 : vector<16x128xf32>, i32 -> vector<16x128xf32>
    %24 = vector.broadcast %1 : vector<1x128xf32> to vector<16x128xf32>
    %25 = arith.mulf %23, %24 : vector<16x128xf32>
    %26 = tpu.concatenate %22, %19, %25 in 0 : vector<16x128xf32>, vector<16x128xf32>, vector<16x128xf32> -> vector<48x128xf32>
    %27 = arith.truncf %26 : vector<48x128xf32> to vector<48x128xbf16>
    %c0_13 = arith.constant 0 : index
    %c0_14 = arith.constant 0 : index
    %28 = vector.load %arg5[%c0_13, %c0_14] : memref<16x48xbf16, #tpu.memory_space<vmem>>, vector<16x48xbf16>
    %cst_15 = arith.constant dense<0.000000e+00> : vector<16x128xf32>
    %29 = tpu.matmul %28, %27, %cst_15 {dimension_numbers = #tpu.dot_dimension_numbers<[1], [0], [0], [1], [0, 0, 1, 1], [], []>} : vector<16x48xbf16>, vector<48x128xbf16>, vector<16x128xf32> -> vector<16x128xf32>
    %c0_16 = arith.constant 0 : index
    %c0_17 = arith.constant 0 : index
    %30 = vector.load %arg6[%c0_16, %c0_17] : memref<16x1xf32, #tpu.memory_space<vmem>>, vector<16x1xf32>
    %31 = vector.broadcast %30 : vector<16x1xf32> to vector<16x128xf32>
    %32 = arith.addf %29, %31 : vector<16x128xf32>
    %33 = arith.addf %32, %4 : vector<16x128xf32>
    %cst_18 = arith.constant 0.000000e+00 : f32
    %34 = vector.broadcast %cst_18 : f32 to vector<16x128xf32>
    %35 = arith.maximumf %33, %34 : vector<16x128xf32>
    %c0_19 = arith.constant 0 : index
    %c0_20 = arith.constant 0 : index
    %c0_21 = arith.constant 0 : index
    %36 = vector.load %arg9[%c0_19, %c0_20, %c0_21] : memref<1x16x128xf32, #tpu.memory_space<vmem>>, vector<1x16x128xf32>
    %37 = vector.shape_cast %36 : vector<1x16x128xf32> to vector<16x128xf32>
    %38 = vector.shape_cast %35 : vector<16x128xf32> to vector<1x16x128xf32>
    tpu.vector_store %arg9[%c0_19, %c0_20, %c0_21], %38 {strides = array<i32>} : memref<1x16x128xf32, #tpu.memory_space<vmem>>, vector<1x16x128xf32>,
    return
  }
  func.func @transform_0(%arg0: i32, %arg1: i32) -> (i32, i32, i32) {
    %c0_i32 = arith.constant 0 : i32
    %c0_i32_0 = arith.constant 0 : i32
    return %arg0, %c0_i32, %arg1 : i32, i32, i32
  }
  func.func @transform_1(%arg0: i32, %arg1: i32) -> (i32, i32) {
    %c0_i32 = arith.constant 0 : i32
    %c0_i32_0 = arith.constant 0 : i32
    %c0_i32_1 = arith.constant 0 : i32
    return %c0_i32, %c0_i32_0 : i32, i32
  }
  func.func @transform_2(%arg0: i32, %arg1: i32) -> (i32, i32) {
    %c0_i32 = arith.constant 0 : i32
    %c0_i32_0 = arith.constant 0 : i32
    %c0_i32_1 = arith.constant 0 : i32
    return %c0_i32, %c0_i32_0 : i32, i32
  }
  func.func @transform_3(%arg0: i32, %arg1: i32) -> (i32, i32) {
    %c0_i32 = arith.constant 0 : i32
    %c0_i32_0 = arith.constant 0 : i32
    %c0_i32_1 = arith.constant 0 : i32
    return %c0_i32, %c0_i32_0 : i32, i32
  }
  func.func @transform_4(%arg0: i32, %arg1: i32) -> (i32, i32) {
    %c0_i32 = arith.constant 0 : i32
    %c0_i32_0 = arith.constant 0 : i32
    %c0_i32_1 = arith.constant 0 : i32
    return %c0_i32, %c0_i32_0 : i32, i32
  }
  func.func @transform_5(%arg0: i32, %arg1: i32) -> (i32, i32) {
    %c0_i32 = arith.constant 0 : i32
    %c0_i32_0 = arith.constant 0 : i32
    %c0_i32_1 = arith.constant 0 : i32
    return %c0_i32, %c0_i32_0 : i32, i32
  }
  func.func @transform_6(%arg0: i32, %arg1: i32) -> (i32, i32) {
    %c0_i32 = arith.constant 0 : i32
    %c0_i32_0 = arith.constant 0 : i32
    %c0_i32_1 = arith.constant 0 : i32
    return %c0_i32, %c0_i32_0 : i32, i32
  }
  func.func @transform_7(%arg0: i32, %arg1: i32) -> (i32, i32, i32) {
    %c0_i32 = arith.constant 0 : i32
    %c0_i32_0 = arith.constant 0 : i32
    return %arg0, %c0_i32, %arg1 : i32, i32, i32
  }
}

</mosaic_0001>

<bundles_post_ra>
// kernel: residual_block_forward.1
= control target key start
LH: loop header
LB: loop body
LE: loop exit
PB: predicated region body
PF: predicated region fallthrough
CT: control target
= control target key end

     0   :  { %s739_s24 = smov 0   ;;  %s741_s25 = smov 0   ;;  %s829_s0 = inlined_call_operand.vmem [shape: bf16[2,16,128], index: 0, kind: input, shape index: {}]   ;;  %s830_s1 = inlined_call_operand.vmem [shape: bf16[16,48], index: 1, kind: input, shape index: {}]   ;;  %s831_s2 = inlined_call_operand.vmem [shape: f32[16,1], index: 2, kind: input, shape index: {}]   ;;  %s832_s3 = inlined_call_operand.vmem [shape: bf16[16,48], index: 3, kind: input, shape index: {}]   ;;  %s833_s4 = inlined_call_operand.vmem [shape: f32[16,1], index: 4, kind: input, shape index: {}]   ;;  %s834_s5 = inlined_call_operand.vmem [shape: f32[1,128], index: 5, kind: input, shape index: {}]   ;;  %s835_s6 = inlined_call_operand.vmem [shape: f32[1,128], index: 6, kind: input, shape index: {}]   ;;  %s836_s7 = inlined_call_operand.vmem [shape: f32[2,16,128], index: 7, kind: output, shape index: {}]  }
   0x1   :  { %s743_s26 = smov 0  }
   0x2 LB: > { %s29_s27 = sadd.s32 1, %s688_s25  ;;  %p581_p0 = scmp.ge.s32.totalorder %s692_s26, 1  ;;  %s692_s26 = sphi %s743_s26, %s17_s26   ;;  %s688_s25 = sphi %s741_s25, %s838_s25   ;;  %s684_s24 = sphi %s739_s24, %s837_s24  }
   0x3   : > { %p31_p1 = scmp.ge.s32.totalorder %s29_s27, 2  ;;  %p256_p2 = scmp.lt.s32.totalorder %s692_s26, 3 }
   0x5   : > { %s840_s27 = smov (%p31_p1, %s29_s27), 0  ;;  %p257_p3 = pnand %p581_p0, %p256_p2 }
   0x6   : > { %p294_p4 = scmp.lt.s32.totalorder (!%p257_p3), %s684_s24, 1  ;;  %v694_v0 = vmov (!%p257_p3), 0.0   ;;  %s695_s9 = smov (!%p257_p3), 1   ;;  %vm696_vm0 = vmmov (!%p257_p3), 0   ;;  %v346_v5 = vld [vmem:[%s831_s2] sm:$0xff] (!%p257_p3)  ;;  %v698_v6 = vmov (!%p257_p3), 0  }
   0x7   : > { %260 = sbr.rel (%p257_p3) target bundleno = 723 (0x2d3), region = 48  ;;  %605 = vmatprep.subr.bf16.mxu0 (!%p257_p3), %v694_v0  ;;  %615 = vmatprep.subr.bf16.mxu1 (!%p257_p3), %v694_v0  ;;  %s697_s10 = smov (!%p257_p3), 127   ;;  %v347_v7 = vld [vmem:[%s831_s2 + $0x8] sm:$0xff] (!%p257_p3)  ;;  %v586_v9 = vld [vmem:[%s834_s5] ss:$0 sm:$0xff] (!%p257_p3)  ;;  %vm363_vm1 = vcmask (!%p257_p3), 392192  }
   0x8   : > { %611 = vmatprep.mubr.msk.bf16.mxu0 (!%p257_p3), %vm696_vm0, %v694_v0  ;;  %621 = vmatprep.mubr.msk.bf16.mxu1 (!%p257_p3), %vm696_vm0, %v694_v0  ;;  %v587_v14 = vld [vmem:[%s835_s6] ss:$0 sm:$0xff] (!%p257_p3)  ;;  %v428_v34 = vld [vmem:[%s833_s4 + $0x8] sm:$0xff] (!%p257_p3) }
   0x9   : > { %664 = vset.pattern.permute.xlu1 (!%p257_p3), %v698_v6  ;;  %665 = vset.pattern.permute.xlu0 (!%p257_p3), %v698_v6  ;;  %v667_v22 = vld [vmem:[%s830_s1] sm:$0xff] (!%p257_p3)  }
   0xa   : > { %350 = vperm.xlu1 (!%p257_p3), %664, %v346_v5   ;;  %v427_v35 = vld [vmem:[%s833_s4] sm:$0xff] (!%p257_p3) }
   0xb   : > { %v668_v46 = vld [vmem:[%s832_s3] sm:$0xff] (!%p257_p3)  }
   0xe   : > { %s842_s24 = smov (!%p294_p4, %s684_s24), 1  ;;  %355 = vperm.xlu1 %664, %v347_v7  }
   0xf   : > { %s595_s28 = sshll.u32 %s842_s24, 3 }
  0x10   : > { %s301_s8 = scalar_lea.vmem %s829_s0, %s595_s28 }
  0x11   : > { %v765_v1 = vld [vmem:[%s301_s8] sm:$0xff]   ;;  %s596_s8 = sshll.u32 %s842_s24, 4 }
  0x12   : > { %v315_v2 = vunpack.c.l.bf16 %v765_v1  ;;  %v316_v3 = vunpack.c.h.bf16 %v765_v1  ;;  %s309_s11 = scalar_lea.vmem %s836_s7, %s596_s8 }
  0x14   : > { %v654_v4 = vpack.i.bf16 %v316_v3, %v315_v2 }
  0x16   : > { %655 = vrot.lane.b32.xlu0 %v654_v4, %s695_s9 }
  0x1a   : > { %660 = vrot.lane.b32.xlu0 %v654_v4, %s697_s10 }
  0x88   : > { %v656_v8 = vpop.permute.xlu0 %655 }
  0x89   : > { %v658_v10 = vunpack.i.h.bf16 %v656_v8  ;;  %v657_v11 = vunpack.i.l.bf16 %v656_v8  ;;  %v351_v23 = vpop.permute.xlu1 %350 }
  0x8b   : > { %v327_v12 = vmul.f32 %v657_v11, %v586_v9  ;;  %v328_v13 = vmul.f32 %v658_v10, %v586_v9 }
  0x8c   : > { %v661_v15 = vpop.permute.xlu0 %660 }
  0x8d   : > { %v341_v16 = vpack.c.bf16 %v328_v13, %v327_v12  ;;  %v663_v17 = vunpack.i.h.bf16 %v661_v15  ;;  %v662_v18 = vunpack.i.l.bf16 %v661_v15  ;;  %v356_v27 = vpop.permute.xlu1 %355 }
  0x8f   : > { %606 = vmatpush3.bf16.msra.mxu0 %v341_v16  ;;  %v340_v19 = vmul.f32 %v663_v17, %v587_v14  ;;  %v339_v20 = vmul.f32 %v662_v18, %v587_v14 }
  0x90   : > { %607 = vmatprep.subr.bf16.mxu0 %v694_v0 }
  0x91   : > { %v343_v21 = vpack.c.bf16 %v340_v19, %v339_v20 }
  0x93   : > { %608 = vmatpush3.bf16.msra.mxu0 %v765_v1 }
  0x94   : > { %609 = vmatprep.subr.bf16.mxu0 %v694_v0 }
  0x97   : > { %610 = vmatpush3.bf16.msra.mxu0 %v343_v21 }
  0x9a   : > { %612 = vmatmul.mubr.msk.bf16.vlgmr.msra.gmra.mrb[0].mxu0 %vm363_vm1, %v667_v22 }
 0x16d   : > { %v401_v24 = vpop.f32.mrb[0].mxu0 }
 0x16e   : > { %v402_v25 = vadd.f32 %v401_v24, %v351_v23  ;;  %v613_v26 = vpop.f32.mrb[1].mxu0 }
 0x16f   : > { %v404_v28 = vpop.f32.mrb[2].mxu0 }
 0x170   : > { %v408_v29 = vmax.f32 %v402_v25, 0.0  ;;  %v405_v30 = vadd.f32 %v404_v28, %v356_v27  ;;  %v614_v31 = vpop.f32.mrb[3].mxu0 }
 0x172   : > { %v409_v32 = vmax.f32 %v405_v30, 0.0  ;;  %410 = vrot.lane.b32.xlu0 %v408_v29, %s695_s9 }
 0x174   : > { %412 = vrot.lane.b32.xlu1 %v409_v32, %s695_s9  ;;  %v423_v33 = vpack.c.bf16 %v409_v32, %v408_v29 }
 0x176   : > { %416 = vrot.lane.b32.xlu0 %v408_v29, %s697_s10 }
 0x178   : > { %418 = vrot.lane.b32.xlu1 %v409_v32, %s697_s10 }
 0x17a   : > { %431 = vperm.xlu0 %665, %v427_v35  }
 0x17c   : > { %436 = vperm.xlu1 %664, %v428_v34  }
 0x1e4   : > { %v411_v36 = vpop.permute.xlu0 %410 }
 0x1e5   : > { %v414_v38 = vmul.f32 %v586_v9, %v411_v36 }
 0x1e6   : > { %v413_v37 = vpop.permute.xlu1 %412 }
 0x1e7   : > { %v415_v39 = vmul.f32 %v586_v9, %v413_v37 }
 0x1e8   : > { %v417_v42 = vpop.permute.xlu0 %416 }
 0x1e9   : > { %v422_v40 = vpack.c.bf16 %v415_v39, %v414_v38  ;;  %v420_v44 = vmul.f32 %v587_v14, %v417_v42 }
 0x1ea   : > { %v419_v41 = vpop.permute.xlu1 %418 }
 0x1eb   : > { %616 = vmatpush3.bf16.msra.mxu1 %v422_v40  ;;  %v421_v43 = vmul.f32 %v587_v14, %v419_v41 }
 0x1ec   : > { %617 = vmatprep.subr.bf16.mxu1 %v694_v0 }
 0x1ed   : > { %v424_v45 = vpack.c.bf16 %v421_v43, %v420_v44 }
 0x1ef   : > { %618 = vmatpush3.bf16.msra.mxu1 %v423_v33 }
 0x1f0   : > { %619 = vmatprep.subr.bf16.mxu1 %v694_v0 }
 0x1f3   : > { %620 = vmatpush3.bf16.msra.mxu1 %v424_v45 }
 0x1f6   : > { %622 = vmatmul.mubr.msk.bf16.vlgmr.msra.gmra.mrb[0].mxu1 %vm363_vm1, %v668_v46 }
 0x1f9   : > { %v432_v47 = vpop.permute.xlu0 %431 }
 0x1fb   : > { %v437_v51 = vpop.permute.xlu1 %436 }
 0x2c9   : > { %v481_v48 = vpop.f32.mrb[0].mxu1 }
 0x2ca   : > { %v482_v49 = vadd.f32 %v481_v48, %v432_v47  ;;  %v623_v50 = vpop.f32.mrb[1].mxu1 }
 0x2cb   : > { %v484_v52 = vpop.f32.mrb[2].mxu1 }
 0x2cc   : > { %v488_v53 = vadd.f32 %v482_v49, %v315_v2  ;;  %v485_v54 = vadd.f32 %v484_v52, %v437_v51  ;;  %v624_v55 = vpop.f32.mrb[3].mxu1 }
 0x2ce   : > { %v490_v56 = vmax.f32 %v488_v53, 0.0  ;;  %v489_v57 = vadd.f32 %v485_v54, %v316_v3 }
 0x2d0   : > { %492 = vst [vmem:[%s309_s11] sm:$0xff] %v490_v56  ;;  %v491_v58 = vmax.f32 %v489_v57, 0.0 }
 0x2d2   : > { %493 = vst [vmem:[%s309_s11 + $0x8] sm:$0xff] %v491_v58 }
 0x2d3 PF: > { %s17_s26 = sadd.s32 1, %s692_s26   ;;  %s837_s24 = smov %s688_s25 }
 0x2d4   : > { %p14_p5 = scmp.ge.s32.totalorder %s17_s26, 4   ;;  %s838_s25 = smov %s840_s27 }
 0x2d6   :  { %16 = sbr.rel (!%p14_p5) target bundleno = 2 (0x2), region = 78 }

</bundles_post_ra>
